<compile_context>
chip_gen: v7x
topology: tpu7x:2x2x1
jax: 0.10.0
libtpu: 0.0.40
codegen_flags: <defaults>
</compile_context>

<pallas_src>
import jax
import jax.numpy as jnp
from jax.experimental import pallas as pl
from jax.experimental.pallas import tpu as pltpu


# ---------------------------------------------------------------------------
# helpers
# ---------------------------------------------------------------------------
_VMEM_LIMIT = 48 * 1024 * 1024      # safe on v7x (64 MiB physical), ample on v5e/v6e
_INV_SQRT2 = 0.7071067811865476


def _tile(n, target, align):
    """Largest divisor of n that is <= target and a multiple of `align`.
    Falls back to the full extent (always a legal block size)."""
    if n <= target:
        return n
    for t in range(target, 0, -1):
        if n % t == 0 and t % align == 0:
            return t
    # TODO(synk): for awkward (prime-ish) extents switch to a cdiv grid with
    # masked edge tiles instead of one full-extent block.
    return n


def _gelu_no_half(z):
    """Exact-erf GELU *without* the leading 0.5 (folded into the out weights).

    erf via Abramowitz & Stegun 7.1.26; the divide uses the EUP approximate
    reciprocal (total |err| ~1e-4, far inside the 2e-2 check tolerance)."""
    x = z * _INV_SQRT2
    ax = jnp.abs(x)
    t = pl.reciprocal(1.0 + 0.3275911 * ax, approx=True)
    poly = ((((1.061405429 * t - 1.453152027) * t + 1.421413741) * t
             - 0.284496736) * t + 0.254829592) * t
    erf_abs = 1.0 - poly * jnp.exp(-ax * ax)
    erf = jnp.where(x >= 0, erf_abs, -erf_abs)
    return z * (1.0 + erf)


# ---------------------------------------------------------------------------
# projection kernels:  px = x @ W1x^T + b1   /   py = y @ W1y^T
# ---------------------------------------------------------------------------
def _linear_kernel(x_ref, w_ref, o_ref):
    # x: (tm, K), w: (K, tn) -> o: (tm, tn)
    o_ref[...] = jnp.dot(x_ref[...], w_ref[...],
                         preferred_element_type=jnp.float32).astype(o_ref.dtype)


def _linear_bias_kernel(x_ref, w_ref, b_ref, o_ref):
    acc = jnp.dot(x_ref[...], w_ref[...], preferred_element_type=jnp.float32)
    o_ref[...] = (acc + b_ref[...].astype(jnp.float32)).astype(o_ref.dtype)


def pallas_linear(x, w_kn, bias=None, *, tm_target=256, tn_target=256):
    """x: (M, K) @ w_kn: (K, N) [weight already transposed at init] (+ bias row)."""
    M, K = x.shape
    N = w_kn.shape[1]
    tm = _tile(M, tm_target, 8)     # sublane dim of x / o blocks
    tn = _tile(N, tn_target, 128)   # lane dim of w / o blocks
    grid = (M // tm, N // tn)

    x_spec = pl.BlockSpec((tm, K), lambda i, j: (i, 0))
    w_spec = pl.BlockSpec((K, tn), lambda i, j: (0, j))
    o_spec = pl.BlockSpec((tm, tn), lambda i, j: (i, j))
    cp = pltpu.CompilerParams(dimension_semantics=("parallel", "parallel"),
                              vmem_limit_bytes=_VMEM_LIMIT)

    if bias is None:
        return pl.pallas_call(
            _linear_kernel,
            out_shape=jax.ShapeDtypeStruct((M, N), x.dtype),
            grid=grid, in_specs=[x_spec, w_spec], out_specs=o_spec,
            compiler_params=cp,
        )(x, w_kn)

    b_row = bias.reshape(1, N).astype(x.dtype)
    b_spec = pl.BlockSpec((1, tn), lambda i, j: (0, j))
    return pl.pallas_call(
        _linear_bias_kernel,
        out_shape=jax.ShapeDtypeStruct((M, N), x.dtype),
        grid=grid, in_specs=[x_spec, w_spec, b_spec], out_specs=o_spec,
        compiler_params=cp,
    )(x, w_kn, b_row)


# ---------------------------------------------------------------------------
# fused cross kernel: out[i,j] = sum_k wo_half[k] * gelu_no_half(px[i,k]+py[j,k]) + bo
#   - n2 on the lane axis (lane-dense accumulator + stores)
#   - unrolled per-d-slice accumulation (no (tn1,tn2,d) intermediate, no XLU
#     lane-reduce / relayout)
# ---------------------------------------------------------------------------
def _cross_out_kernel(px_ref, pyt_ref, wo_ref, bo_ref, o_ref):
    # px_ref: (tn1, d)   pyt_ref: (d, tn2)   wo_ref: SMEM (d,)   bo_ref: SMEM (1,)
    tn1, d = px_ref.shape
    tn2 = o_ref.shape[-1]
    acc = jnp.zeros((tn1, tn2), jnp.float32)
    # NOTE: d is a trace-time constant; unrolled loop keeps all indexing static.
    for k in range(d):
        xk = px_ref[:, k:k + 1]           # (tn1, 1) column of px   (sublane-varying)
        yk = pyt_ref[k:k + 1, :]          # (1, tn2) row of py^T    (lane-varying)
        z = xk + yk                       # (tn1, tn2) pair features, lane-dense
        acc = acc + wo_ref[k] * _gelu_no_half(z)
    o_ref[...] = (acc + bo_ref[0]).astype(o_ref.dtype)


def pallas_cross_out(px, py_t, wo_half, bo, *, tn1_target=32, tn2_target=256):
    """px: (b, n1, d)  py_t: (b, d, n2)  wo_half: (d,)  bo: (1,) -> (b, n1, n2)."""
    b, n1, d = px.shape
    _, _, n2 = py_t.shape

    tn2 = _tile(n2, tn2_target, 128)                  # lane dim of the output block
    # keep the (tn1, tn2) f32 accumulator (+ GELU temporaries) comfortably in
    # the 64 x 4 KiB vreg file: acc <= ~8 vregs.
    rows_cap = max(8, 8192 // max(tn2, 1))
    tn1 = _tile(n1, min(tn1_target, rows_cap), 8)     # sublane dim

    # i (n1) innermost: px is the streamed operand (re-fetch factor n2/tn2),
    # py^T stays resident in VMEM across the inner loop.
    grid = (b, n2 // tn2, n1 // tn1)

    return pl.pallas_call(
        _cross_out_kernel,
        out_shape=jax.ShapeDtypeStruct((b, n1, n2), px.dtype),
        grid=grid,
        in_specs=[
            pl.BlockSpec((None, tn1, d), lambda bi, j, i: (bi, i, 0)),   # px
            pl.BlockSpec((None, d, tn2), lambda bi, j, i: (bi, 0, j)),   # py^T
            pl.BlockSpec(memory_space=pltpu.MemorySpace.SMEM),           # wo_half (d,)
            pl.BlockSpec(memory_space=pltpu.MemorySpace.SMEM),           # bo (1,)
        ],
        out_specs=pl.BlockSpec((None, tn1, tn2), lambda bi, j, i: (bi, i, j)),
        compiler_params=pltpu.CompilerParams(
            dimension_semantics=("parallel", "parallel", "arbitrary"),
            vmem_limit_bytes=_VMEM_LIMIT),
    )(px, py_t, wo_half, bo)


# ---------------------------------------------------------------------------
# CrossOutLayer module (parameters + forward glue)
# ---------------------------------------------------------------------------
class CrossOutLayerPallas:
    def __init__(self, dim, key=None):
        self.dim = dim
        key = jax.random.PRNGKey(0) if key is None else key
        ks = jax.random.split(key, 4)
        f32 = jnp.float32

        # nn.Linear default init (uniform +/- 1/sqrt(fan_in)), torch (out, in) layout.
        b1_bound = 1.0 / (2 * dim) ** 0.5
        self.w1 = jax.random.uniform(ks[0], (dim, 2 * dim), f32, -b1_bound, b1_bound)
        self.b1 = jax.random.uniform(ks[1], (dim,), f32, -b1_bound, b1_bound)
        b2_bound = 1.0 / dim ** 0.5
        self.wo = jax.random.uniform(ks[2], (1, dim), f32, -b2_bound, b2_bound)
        self.bo = jax.random.uniform(ks[3], (1,), f32, -b2_bound, b2_bound)

        # Pre-transpose / pre-shape once at init: no per-call weight transposes.
        # Split linear1 into its x-half and y-half; fold GELU's 0.5 into wo.
        self.w1x_kn = jnp.asarray(self.w1[:, :dim].T)        # (d, d) acts on x
        self.w1y_kn = jnp.asarray(self.w1[:, dim:].T)        # (d, d) acts on y
        self.b1_row = self.b1.reshape(1, dim)
        self.wo_half = (0.5 * self.wo).reshape(dim)          # (d,) SMEM scalars
        self.bo_vec = self.bo.reshape(1)

    def __call__(self, x, y):
        b, n1, d = x.shape
        _, n2, _ = y.shape
        # linear1(concat([x_i, y_j])) == px[i] + py[j]  (b1 folded into px),
        # so the (b, n1, n2, 2d) pair tensor is never materialized in HBM.
        px = pallas_linear(x.reshape(b * n1, d), self.w1x_kn, self.b1_row).reshape(b, n1, d)
        py = pallas_linear(y.reshape(b * n2, d), self.w1y_kn, None).reshape(b, n2, d)
        # tiny XLA transpose (b*n2*d elems) so n2 lands on the lane axis of the
        # fused kernel; negligible next to the b*n1*n2*d cross work.
        py_t = jnp.swapaxes(py, 1, 2)                        # (b, d, n2)
        # fused: broadcast pair-sum + exact GELU + `out` Linear (per-d accumulation)
        return pallas_cross_out(px, py_t, self.wo_half, self.bo_vec)


# ---------------------------------------------------------------------------
# Pure-JAX reference mirroring the PyTorch forward exactly
# ---------------------------------------------------------------------------
def reference_forward(mod, x, y):
    b, n1, d = x.shape
    _, n2, _ = y.shape
    x_exp = jnp.broadcast_to(x[:, :, None, :], (b, n1, n2, d))
    y_exp = jnp.broadcast_to(y[:, None, :, :], (b, n1, n2, d))
    inp = jnp.concatenate([x_exp, y_exp], axis=-1)           # (b, n1, n2, 2d)
    o1 = inp @ mod.w1.T + mod.b1
    o2 = jax.nn.gelu(o1, approximate=False)                  # nn.GELU() default (erf)
    o3 = o2 @ mod.wo.T + mod.bo
    return o3[..., 0]                                        # squeeze(3)


if __name__ == "__main__":
    # Small shapes consistent with the module: batch=2, n1=16, n2=8, dim=32
    b, n1, n2, dim = 2, 16, 8, 32
    key = jax.random.PRNGKey(0)
    kx, ky, kp = jax.random.split(key, 3)
    x = jax.random.normal(kx, (b, n1, dim), jnp.float32)
    y = jax.random.normal(ky, (b, n2, dim), jnp.float32)

    mod = CrossOutLayerPallas(dim, key=kp)
    out = mod(x, y)
    out = jax.block_until_ready(out)

    ref = reference_forward(mod, x, y)
    assert out.shape == (b, n1, n2)
    max_err = float(jnp.max(jnp.abs(out - ref)))
    assert jnp.allclose(out, ref, rtol=2e-2, atol=2e-2), f"max|diff|={max_err}"

    print("KERNEL_OK")
</pallas_src>

<mosaic_0001>
module attributes {stable_mosaic.version = 11 : i64} {
  func.func @_linear_bias_kernel(%arg0: i32, %arg1: i32, %arg2: memref<32x32xf32, #tpu.memory_space<vmem>>, %arg3: memref<32x32xf32, #tpu.memory_space<vmem>>, %arg4: memref<1x32xf32, #tpu.memory_space<vmem>>, %arg5: memref<32x32xf32, #tpu.memory_space<vmem>>) attributes {dimension_semantics = [#tpu.dimension_semantics<parallel>, #tpu.dimension_semantics<parallel>], iteration_bounds = array<i64: 1, 1>, scalar_prefetch = 0 : i64, scratch_operands = 0 : i64, tpu.core_type = #tpu.core_type<tc>, window_params = [{transform_indices = @transform_0, window_bounds = array<i64: 32, 32>}, {transform_indices = @transform_1, window_bounds = array<i64: 32, 32>}, {transform_indices = @transform_2, window_bounds = array<i64: 1, 32>}, {transform_indices = @transform_3, window_bounds = array<i64: 32, 32>}]} {
    %c0 = arith.constant 0 : index
    %c0_0 = arith.constant 0 : index
    %0 = vector.load %arg2[%c0, %c0_0] : memref<32x32xf32, #tpu.memory_space<vmem>>, vector<32x32xf32>
    %c0_1 = arith.constant 0 : index
    %c0_2 = arith.constant 0 : index
    %1 = vector.load %arg3[%c0_1, %c0_2] : memref<32x32xf32, #tpu.memory_space<vmem>>, vector<32x32xf32>
    %cst = arith.constant dense<0.000000e+00> : vector<32x32xf32>
    %2 = tpu.matmul %0, %1, %cst {dimension_numbers = #tpu.dot_dimension_numbers<[1], [0], [0], [1], [0, 0, 1, 1], [], []>} : vector<32x32xf32>, vector<32x32xf32>, vector<32x32xf32> -> vector<32x32xf32>
    %c0_3 = arith.constant 0 : index
    %c0_4 = arith.constant 0 : index
    %3 = vector.load %arg4[%c0_3, %c0_4] : memref<1x32xf32, #tpu.memory_space<vmem>>, vector<1x32xf32>
    %4 = vector.broadcast %3 : vector<1x32xf32> to vector<32x32xf32>
    %5 = arith.addf %2, %4 : vector<32x32xf32>
    %c0_5 = arith.constant 0 : index
    %c0_6 = arith.constant 0 : index
    %6 = vector.load %arg5[%c0_5, %c0_6] : memref<32x32xf32, #tpu.memory_space<vmem>>, vector<32x32xf32>
    tpu.vector_store %arg5[%c0_5, %c0_6], %5 {strides = array<i32>} : memref<32x32xf32, #tpu.memory_space<vmem>>, vector<32x32xf32>,
    return
  }
  func.func @transform_0(%arg0: i32, %arg1: i32) -> (i32, i32) {
    %c0_i32 = arith.constant 0 : i32
    %c0_i32_0 = arith.constant 0 : i32
    return %arg0, %c0_i32 : i32, i32
  }
  func.func @transform_1(%arg0: i32, %arg1: i32) -> (i32, i32) {
    %c0_i32 = arith.constant 0 : i32
    %c0_i32_0 = arith.constant 0 : i32
    return %c0_i32, %arg1 : i32, i32
  }
  func.func @transform_2(%arg0: i32, %arg1: i32) -> (i32, i32) {
    %c0_i32 = arith.constant 0 : i32
    %c0_i32_0 = arith.constant 0 : i32
    return %c0_i32, %arg1 : i32, i32
  }
  func.func @transform_3(%arg0: i32, %arg1: i32) -> (i32, i32) {
    %c0_i32 = arith.constant 0 : i32
    return %arg0, %arg1 : i32, i32
  }
}

</mosaic_0001>

<bundles_post_ra>
// kernel: tpu_custom_call.1
= control target key start
LH: loop header
LB: loop body
LE: loop exit
PB: predicated region body
PF: predicated region fallthrough
CT: control target
= control target key end

     0   :  { %8 = vsyncpa [#allocation3], 0  ;;  %s375_s0 = inlined_call_operand.hbm [shape: f32[32,32], index: 0, kind: input, shape index: {}]   ;;  %s376_s1 = inlined_call_operand.hbm [shape: f32[32,32], index: 1, kind: input, shape index: {}]   ;;  %s377_s2 = inlined_call_operand.vmem [shape: f32[1,32], index: 2, kind: input, shape index: {}]   ;;  %s378_s3 = inlined_call_operand.hbm [shape: f32[32,32], index: 3, kind: output, shape index: {}]  }
   0x1   :  { %9 = vsyncpa [#allocation6], 0 }
   0x2   :  { %10 = vsyncpa [#allocation4], 0  ;;  %s294_s12 = smov [#allocation2]   ;;  %s222_s16 = scalar_lea.hbm %s375_s0, 512 }
   0x3   :  { %s16_s13 = sshll.u32 %s294_s12, 4  ;;  %p223_p0 = scmp.ne.s32.totalorder %s375_s0, %s222_s16  ;;  %s17_s13 = int_to_ptr.vmem [resolvable:$true] %s16_s13 }
   0x4   :  { %p226_p1 = scmp.lt.u32.totalorder %s222_s16, %s375_s0 }
   0x6   :  { %p228_p2 = pnand %p226_p1, %p223_p0 }
   0x8   :  { %231 = shalt.err (!%p228_p2)
}
   0x9   :  { %s232_s21 = scalar_lea.vmem %s17_s13, 512  ;;  %p237_p4 = scmp.lt.s32.totalorder %s17_s13, %s17_s13 }
   0xa   :  { %p233_p3 = scmp.ne.s32.totalorder %s17_s13, %s232_s21  ;;  %p238_p5 = scmp.lt.s32.totalorder %s232_s21, %s232_s21 }
   0xc   :  { %p239_p6 = por %p238_p5, %p237_p4 }
   0xe   :  { %p240_p7 = pnand %p239_p6, %p233_p3 }
  0x10   :  { %243 = shalt.err (!%p240_p7)
}
  0x11   :  { %s295_s22 = smov 128   ;;  %s296_s23 = smov 8  }
  0x12   :  { %22 = dma.hbm_to_vmem [thread:$0]  %s375_s0, 512, %s17_s13, [#allocation3], %s295_s22, %s295_s22, %s296_s23  }
  0x13   :  { %s297_s26 = smov [#allocation5]   ;;  %s244_s30 = scalar_lea.hbm %s376_s1, 512 }
  0x14   :  { %s28_s27 = sshll.u32 %s297_s26, 4  ;;  %p245_p8 = scmp.ne.s32.totalorder %s376_s1, %s244_s30  ;;  %s29_s27 = int_to_ptr.vmem [resolvable:$true] %s28_s27 }
  0x15   :  { %p248_p9 = scmp.lt.u32.totalorder %s244_s30, %s376_s1 }
  0x17   :  { %p250_p10 = pnand %p248_p9, %p245_p8 }
  0x19   :  { %253 = shalt.err (!%p250_p10)
}
  0x1a   :  { %s254_s8 = scalar_lea.vmem %s29_s27, 512  ;;  %p259_p12 = scmp.lt.s32.totalorder %s29_s27, %s29_s27 }
  0x1b   :  { %p255_p11 = scmp.ne.s32.totalorder %s29_s27, %s254_s8  ;;  %p260_p13 = scmp.lt.s32.totalorder %s254_s8, %s254_s8 }
  0x1d   :  { %p261_p0 = por %p260_p13, %p259_p12 }
  0x1f   :  { %p262_p1 = pnand %p261_p0, %p255_p11 }
  0x21   :  { %265 = shalt.err (!%p262_p1)
}
  0x22   :  { %34 = dma.hbm_to_vmem [thread:$0]  %s376_s1, 512, %s29_s27, [#allocation6], %s295_s22, %s295_s22, %s296_s23  }
  0x23   :  { %288 = dma.done.wait [#allocation3], 512  }
  0x24   :  { %289 = vsyncadd [#allocation3], 4294966784 }
  0x25   :  { %290 = dma.done.wait [#allocation6], 512  }
  0x26   :  { %291 = vsyncadd [#allocation6], 4294966784  ;;  %vm58_vm0 = vcmask 261120   ;;  %v47_v0 = vld [vmem:[#allocation5] sm:$0xff]  ;;  %v48_v1 = vld [vmem:[#allocation5 + $0x8] sm:$0xff]  ;;  %s298_s11 = smov [#allocation7]  }
  0x27   :  { %v49_v2 = vld [vmem:[#allocation5 + $0x10] sm:$0xff]  ;;  %v205_v3 = vpack.c.bf16 %v48_v1, %v47_v0  ;;  %v50_v4 = vld [vmem:[#allocation5 + $0x18] sm:$0xff]  ;;  %v43_v5 = vld [vmem:[#allocation2] sm:$0xff]  ;;  %s165_s12 = sshll.u32 %s298_s11, 4  ;;  %s166_s12 = int_to_ptr.vmem [resolvable:$true] %s165_s12 }
  0x28   :  { %v45_v6 = vld [vmem:[#allocation2 + $0x10] sm:$0xff]  ;;  %v209_v7 = vpack.c.bf16 %v50_v4, %v49_v2  ;;  %199 = vmatprep.mubr.msk.f32.mxu0 %vm58_vm0, %v43_v5  ;;  %v44_v8 = vld [vmem:[#allocation2 + $0x8] sm:$0xff]  ;;  %v46_v9 = vld [vmem:[#allocation2 + $0x18] sm:$0xff]  ;;  %p271_p3 = scmp.lt.s32.totalorder %s166_s12, %s166_s12 }
  0x29   :  { %202 = vmatprep.mubr.msk.f32.mxu1 %vm58_vm0, %v45_v6  ;;  %206 = vmatprep.subr.bf16.mxu0 %v205_v3  ;;  %v178_v10 = vld [vmem:[%s377_s2] ss:$0 sm:$0xff]  ;;  %s266_s2 = scalar_lea.vmem %s166_s12, 512 }
  0x2a   :  { %213 = vmatprep.subr.bf16.mxu1 %v205_v3  ;;  %208 = vmatpush3.bf16.msra.mxu0 %v205_v3  ;;  %p267_p2 = scmp.ne.s32.totalorder %s166_s12, %s266_s2  ;;  %p272_p4 = scmp.lt.s32.totalorder %s266_s2, %s266_s2 }
  0x2b   :  { %215 = vmatpush3.bf16.msra.mxu1 %v205_v3  ;;  %210 = vmatprep.subr.bf16.mxu0 %v209_v7 }
  0x2c   :  { %214 = vmatprep.subr.bf16.mxu1 %v209_v7  ;;  %p273_p5 = por %p272_p4, %p271_p3 }
  0x2e   :  { %212 = vmatpush3.bf16.msra.mxu0 %v209_v7  ;;  %p274_p6 = pnand %p273_p5, %p267_p2 }
  0x2f   :  { %216 = vmatpush3.bf16.msra.mxu1 %v209_v7 }
  0x31   :  { %200 = vmatmul.mubr.msk.f32.vlgmr.msra.gmra.mrb[0].mxu0 %vm58_vm0, %v44_v8 }
  0x32   :  { %203 = vmatmul.mubr.msk.f32.vlgmr.msra.gmra.mrb[0].mxu1 %vm58_vm0, %v46_v9 }
 0x104   :  { %v201_v11 = vpop.f32.mrb[0].mxu0 }
 0x105   :  { %v204_v12 = vpop.f32.mrb[0].mxu1  ;;  %v143_v13 = vadd.f32 %v201_v11, %v178_v10  ;;  %v137_v15 = vpop.f32.mrb[1].mxu0 }
 0x106   :  { %v153_v14 = vadd.f32 %v204_v12, %v178_v10  ;;  %v147_v16 = vpop.f32.mrb[1].mxu1  ;;  %v138_v17 = vadd.f32 %v178_v10, %v137_v15 }
 0x107   :  { %v148_v18 = vadd.f32 %v178_v10, %v147_v16  ;;  %157 = vst.msk [vmem:[#allocation7 + $0x8] sm:$0xff] %vm58_vm0, %v143_v13 }
 0x108   :  { %159 = vst.msk [vmem:[#allocation7 + $0x18] sm:$0xff] %vm58_vm0, %v153_v14  ;;  %156 = vst.msk [vmem:[#allocation7] sm:$0xff] %vm58_vm0, %v138_v17 }
 0x109   :  { %158 = vst.msk [vmem:[#allocation7 + $0x10] sm:$0xff] %vm58_vm0, %v148_v18 }
 0x10a   :  { %277 = shalt.err (!%p274_p6)
}
 0x10b   :  { %s278_s15 = scalar_lea.hbm %s378_s3, 512 }
 0x10c   :  { %p279_p7 = scmp.ne.s32.totalorder %s378_s3, %s278_s15  ;;  %p282_p8 = scmp.lt.u32.totalorder %s278_s15, %s378_s3 }
 0x10e   :  { %p284_p9 = pnand %p282_p8, %p279_p7 }
 0x110   :  { %287 = shalt.err (!%p284_p9)
}
 0x111   :  { %171 = dma.vmem_to_hbm [thread:$0]  %s166_s12, 512, %s378_s3, [#allocation4], %s295_s22, %s295_s22, %s296_s23  }
 0x112   :  { %292 = dma.done.wait [#allocation4], 512  }
 0x113   :  { %293 = vsyncadd [#allocation4], 4294966784 }
 0x114   :  { %175 = vsyncpa [#allocation3], 1 }
 0x115   :  { %176 = vsyncpa [#allocation6], 1 }
 0x116   :  { %177 = vsyncpa [#allocation4], 1 }

</bundles_post_ra>
